<compile_context>
chip_gen: v7x
topology: tpu7x:2x2x1
jax: 0.10.0
libtpu: 0.0.40
codegen_flags: <defaults>
</compile_context>

<pallas_src>
import functools

import jax
import jax.numpy as jnp
import numpy as np
from jax.experimental import pallas as pl
from jax.experimental.pallas import tpu as pltpu

_LANE = 128


def _hdr_ff_kernel(*refs, eps, factor, inv_two_sigma2, have_w, have_reg):
    """Elementwise HDR loss on (TS, 128) f32 tiles; partial sums are
    accumulated into the (revisited) lane-dense output blocks."""
    n_in = 4 + int(have_w) + int(have_reg)
    in_refs, out_refs = refs[:n_in], refs[n_in:]

    in_re = in_refs[0][...]
    in_im = in_refs[1][...]
    tg_re = in_refs[2][...]
    tg_im = in_refs[3][...]
    k = 4
    w = None
    d2 = None
    if have_w:
        w = in_refs[k][...]
        k += 1
    if have_reg:
        d2 = in_refs[k][...]
        k += 1
    loss_acc = out_refs[0]
    reg_acc = out_refs[1] if have_reg else None

    inner = pl.program_id(1)

    @pl.when(inner == 0)
    def _init():
        loss_acc[...] = jnp.zeros_like(loss_acc)
        if have_reg:
            reg_acc[...] = jnp.zeros_like(reg_acc)

    # |complex| = sqrt(re^2 + im^2); log(|.| + 1e-4) as in the module.
    in_abs = jnp.sqrt(in_re * in_re + in_im * in_im)
    tg_abs = jnp.sqrt(tg_re * tg_re + tg_im * tg_im)
    log_in = jnp.log(in_abs + 1e-4)
    log_tg = jnp.log(tg_abs + 1e-4)

    err = log_in - log_tg
    denom = jnp.abs(log_in) + eps              # .detach() is identity in forward
    inv = pl.reciprocal(denom, approx=True)    # EUP slot (free next to VPU work)
    inv = inv * (2.0 - denom * inv)            # Newton step 1
    inv = inv * (2.0 - denom * inv)            # Newton step 2 -> f32 accurate
    inv2 = inv * inv

    loss = err * err * inv2                    # == (|err| / denom) ** 2
    if have_w:
        loss = loss * w
    loss_acc[...] += loss

    if have_reg:
        filt = jnp.exp(d2 * (-inv_two_sigma2))
        reg_err = log_in * (1.0 - filt)        # == log_in - log_in * filt
        reg_acc[...] += factor * (reg_err * reg_err) * inv2


def _round_up(a, b):
    return -(-a // b) * b


class HDRLossFF:
    """Pallas TPU implementation of HDRLoss_FF.forward (reduce=True)."""

    def __init__(self, hdr_ff_sigma=1, hdr_eps=0.01, hdr_ff_factor=0):
        self.sigma = float(hdr_ff_sigma)
        self.eps = float(hdr_eps)
        self.factor = float(hdr_ff_factor)
        self._fwd = jax.jit(self._forward)

    def __call__(self, inp, target, kcoords, weights=None):
        return self._fwd(inp, target, kcoords, weights)

    def _forward(self, inp, target, kcoords, weights):
        B, N, C, two = inp.shape
        assert two == 2 and target.shape == inp.shape
        M = B * N
        E = M * C
        have_w = weights is not None
        have_reg = self.factor != 0.0

        # ---- tiling: flat per-element streams viewed as (rows, 128) ----
        rows_raw = -(-E // _LANE)
        ts = min(1024, max(8, _round_up(rows_raw, 8)))   # sublane tile size
        n_tiles = -(-rows_raw // ts)
        n_outer = 2 if n_tiles >= 2 else 1               # v7x: one per core
        n_tiles = _round_up(n_tiles, n_outer)
        n_inner = n_tiles // n_outer
        rows = n_tiles * ts
        pad_e = rows * _LANE

        def plane(flat):
            flat = flat.astype(jnp.float32)
            return jnp.pad(flat, (0, pad_e - E)).reshape(rows, _LANE)

        # re/im de-interleave + pad: one fused XLA pass per plane.
        # TODO(synk): move the even/odd lane de-interleave into the kernel
        # (pltpu.roll swizzle on interleaved data) to drop this extra HBM pass.
        v_in = inp.astype(jnp.float32).reshape(E, 2)
        v_tg = target.astype(jnp.float32).reshape(E, 2)
        streams = [plane(v_in[:, 0]), plane(v_in[:, 1]),
                   plane(v_tg[:, 0]), plane(v_tg[:, 1])]
        if have_w:
            w_e = jnp.broadcast_to(
                weights.astype(jnp.float32).reshape(M, 1), (M, C)).reshape(E)
            streams.append(plane(w_e))
        if have_reg:
            kc = kcoords.astype(jnp.float32).reshape(M, -1)
            d2 = kc[:, 0] ** 2 + kc[:, 1] ** 2 + kc[:, 2] ** 2   # per sample
            d2_e = jnp.broadcast_to(d2.reshape(M, 1), (M, C)).reshape(E)
            streams.append(plane(d2_e))

        in_spec = pl.BlockSpec((ts, _LANE), lambda o, i: (o * n_inner + i, 0))
        acc_spec = pl.BlockSpec((ts, _LANE), lambda o, i: (o, 0))
        acc_shape = jax.ShapeDtypeStruct((n_outer * ts, _LANE), jnp.float32)
        n_out = 2 if have_reg else 1

        kernel = functools.partial(
            _hdr_ff_kernel, eps=self.eps, factor=self.factor,
            inv_two_sigma2=1.0 / (2.0 * self.sigma * self.sigma),
            have_w=have_w, have_reg=have_reg)

        outs = pl.pallas_call(
            kernel,
            out_shape=(acc_shape,) * n_out,
            grid_spec=pltpu.PrefetchScalarGridSpec(
                num_scalar_prefetch=0,
                grid=(n_outer, n_inner),
                in_specs=[in_spec] * len(streams),
                out_specs=(acc_spec,) * n_out),
            compiler_params=pltpu.CompilerParams(
                dimension_semantics=("parallel", "arbitrary")),
        )(*streams)
        if not isinstance(outs, (tuple, list)):
            outs = (outs,)

        n_elems = float(M * C)
        loss_mean = jnp.sum(outs[0]) / n_elems
        if have_reg:
            reg_mean = jnp.sum(outs[1]) / n_elems
        else:
            reg_mean = jnp.float32(0.0)
        return loss_mean + reg_mean, reg_mean


def _ref_hdr_loss(inp, target, kcoords, weights, sigma, eps, factor):
    """Plain-JAX reference mirroring the PyTorch forward (reduce=True)."""
    in_abs = jnp.sqrt(inp[..., 0] ** 2 + inp[..., 1] ** 2)
    tg_abs = jnp.sqrt(target[..., 0] ** 2 + target[..., 1] ** 2)
    log_in = jnp.log(in_abs + 1e-4)
    log_tg = jnp.log(tg_abs + 1e-4)
    err = log_in - log_tg
    denom = jnp.abs(log_in) + eps
    loss = (jnp.abs(err) / denom) ** 2
    if weights is not None:
        loss = loss * weights[..., None]
    dist2 = (kcoords[..., 0] ** 2 + kcoords[..., 1] ** 2
             + kcoords[..., 2] ** 2)
    filt = jnp.exp(-dist2 / (2.0 * sigma ** 2))[..., None]
    reg_err = log_in - log_in * filt
    reg = factor * (jnp.abs(reg_err) / denom) ** 2
    return loss.mean() + reg.mean(), reg.mean()


def _check(got, want, rtol, atol):
    np.testing.assert_allclose(np.asarray(got), np.asarray(want),
                               rtol=rtol, atol=atol)


if __name__ == "__main__":
    sigma, eps, factor = 1.0, 0.01, 0.5

    # ---- small test: weights + frequency-filter regularizer (full path) ----
    B, N, C = 2, 64, 4
    key = jax.random.PRNGKey(0)
    k1, k2, k3, k4 = jax.random.split(key, 4)
    inp = jax.random.normal(k1, (B, N, C, 2), jnp.float32)
    target = jax.random.normal(k2, (B, N, C, 2), jnp.float32)
    kcoords = jax.random.uniform(k3, (B, N, 3), jnp.float32, -0.5, 0.5)
    weights = jax.random.uniform(k4, (B, N), jnp.float32, 0.5, 1.5)

    loss_fn = HDRLossFF(hdr_ff_sigma=sigma, hdr_eps=eps, hdr_ff_factor=factor)
    total, reg = loss_fn(inp, target, kcoords, weights)
    total = jax.block_until_ready(total)
    reg = jax.block_until_ready(reg)
    ref_total, ref_reg = _ref_hdr_loss(inp, target, kcoords, weights,
                                       sigma, eps, factor)
    _check(total, ref_total, 1e-5, 1e-6)
    _check(reg, ref_reg, 1e-5, 1e-6)

    # ---- small test: module defaults (no weights, factor == 0) ----
    loss_fn0 = HDRLossFF(hdr_ff_sigma=sigma, hdr_eps=eps, hdr_ff_factor=0.0)
    total0, reg0 = loss_fn0(inp, target, kcoords, None)
    total0 = jax.block_until_ready(total0)
    ref_total0, ref_reg0 = _ref_hdr_loss(inp, target, kcoords, None,
                                         sigma, eps, 0.0)
    _check(total0, ref_total0, 1e-5, 1e-6)
    _check(reg0, ref_reg0, 1e-5, 1e-6)

    # ---- larger test: exercises multi-tile + 2-way parallel accumulation ----
    B2, N2, C2 = 2, 51200, 4
    j1, j2, j3, j4 = jax.random.split(jax.random.PRNGKey(0), 4)
    inp2 = jax.random.normal(j1, (B2, N2, C2, 2), jnp.float32)
    target2 = jax.random.normal(j2, (B2, N2, C2, 2), jnp.float32)
    kcoords2 = jax.random.uniform(j3, (B2, N2, 3), jnp.float32, -0.5, 0.5)
    weights2 = jax.random.uniform(j4, (B2, N2), jnp.float32, 0.5, 1.5)
    total2, reg2 = loss_fn(inp2, target2, kcoords2, weights2)
    total2 = jax.block_until_ready(total2)
    reg2 = jax.block_until_ready(reg2)
    ref_total2, ref_reg2 = _ref_hdr_loss(inp2, target2, kcoords2, weights2,
                                         sigma, eps, factor)
    _check(total2, ref_total2, 1e-4, 1e-6)
    _check(reg2, ref_reg2, 1e-4, 1e-6)

    print("KERNEL_OK")
</pallas_src>

<mosaic_0001>
module attributes {stable_mosaic.version = 11 : i64} {
  func.func @_hdr_ff_kernel(%arg0: i32, %arg1: i32, %arg2: memref<8x128xf32, #tpu.memory_space<vmem>>, %arg3: memref<8x128xf32, #tpu.memory_space<vmem>>, %arg4: memref<8x128xf32, #tpu.memory_space<vmem>>, %arg5: memref<8x128xf32, #tpu.memory_space<vmem>>, %arg6: memref<8x128xf32, #tpu.memory_space<vmem>>, %arg7: memref<8x128xf32, #tpu.memory_space<vmem>>, %arg8: memref<8x128xf32, #tpu.memory_space<vmem>>, %arg9: memref<8x128xf32, #tpu.memory_space<vmem>>) attributes {dimension_semantics = [#tpu.dimension_semantics<parallel>, #tpu.dimension_semantics<arbitrary>], iteration_bounds = array<i64: 1, 1>, scalar_prefetch = 0 : i64, scratch_operands = 0 : i64, tpu.core_type = #tpu.core_type<tc>, window_params = [{transform_indices = @transform_0, window_bounds = array<i64: 8, 128>}, {transform_indices = @transform_1, window_bounds = array<i64: 8, 128>}, {transform_indices = @transform_2, window_bounds = array<i64: 8, 128>}, {transform_indices = @transform_3, window_bounds = array<i64: 8, 128>}, {transform_indices = @transform_4, window_bounds = array<i64: 8, 128>}, {transform_indices = @transform_5, window_bounds = array<i64: 8, 128>}, {transform_indices = @transform_6, window_bounds = array<i64: 8, 128>}, {transform_indices = @transform_7, window_bounds = array<i64: 8, 128>}]} {
    %c0 = arith.constant 0 : index
    %c0_0 = arith.constant 0 : index
    %0 = vector.load %arg2[%c0, %c0_0] : memref<8x128xf32, #tpu.memory_space<vmem>>, vector<8x128xf32>
    %c0_1 = arith.constant 0 : index
    %c0_2 = arith.constant 0 : index
    %1 = vector.load %arg3[%c0_1, %c0_2] : memref<8x128xf32, #tpu.memory_space<vmem>>, vector<8x128xf32>
    %c0_3 = arith.constant 0 : index
    %c0_4 = arith.constant 0 : index
    %2 = vector.load %arg4[%c0_3, %c0_4] : memref<8x128xf32, #tpu.memory_space<vmem>>, vector<8x128xf32>
    %c0_5 = arith.constant 0 : index
    %c0_6 = arith.constant 0 : index
    %3 = vector.load %arg5[%c0_5, %c0_6] : memref<8x128xf32, #tpu.memory_space<vmem>>, vector<8x128xf32>
    %c0_7 = arith.constant 0 : index
    %c0_8 = arith.constant 0 : index
    %4 = vector.load %arg6[%c0_7, %c0_8] : memref<8x128xf32, #tpu.memory_space<vmem>>, vector<8x128xf32>
    %c0_9 = arith.constant 0 : index
    %c0_10 = arith.constant 0 : index
    %5 = vector.load %arg7[%c0_9, %c0_10] : memref<8x128xf32, #tpu.memory_space<vmem>>, vector<8x128xf32>
    %c0_i32 = arith.constant 0 : i32
    %6 = arith.cmpi eq, %arg1, %c0_i32 : i32
    %7 = arith.extui %6 : i1 to i32
    %c0_i32_11 = arith.constant 0 : i32
    %8 = arith.cmpi ne, %7, %c0_i32_11 : i32
    scf.if %8 {
      %cst_27 = arith.constant 0.000000e+00 : f32
      %56 = vector.broadcast %cst_27 : f32 to vector<8x128xf32>
      %c0_28 = arith.constant 0 : index
      %c0_29 = arith.constant 0 : index
      %57 = vector.load %arg8[%c0_28, %c0_29] : memref<8x128xf32, #tpu.memory_space<vmem>>, vector<8x128xf32>
      tpu.vector_store %arg8[%c0_28, %c0_29], %56 {strides = array<i32>} : memref<8x128xf32, #tpu.memory_space<vmem>>, vector<8x128xf32>,
      %cst_30 = arith.constant 0.000000e+00 : f32
      %58 = vector.broadcast %cst_30 : f32 to vector<8x128xf32>
      %c0_31 = arith.constant 0 : index
      %c0_32 = arith.constant 0 : index
      %59 = vector.load %arg9[%c0_31, %c0_32] : memref<8x128xf32, #tpu.memory_space<vmem>>, vector<8x128xf32>
      tpu.vector_store %arg9[%c0_31, %c0_32], %58 {strides = array<i32>} : memref<8x128xf32, #tpu.memory_space<vmem>>, vector<8x128xf32>,
    } else {
    }
    %9 = arith.mulf %0, %0 : vector<8x128xf32>
    %10 = arith.mulf %1, %1 : vector<8x128xf32>
    %11 = arith.addf %9, %10 : vector<8x128xf32>
    %12 = math.sqrt %11 : vector<8x128xf32>
    %13 = arith.mulf %2, %2 : vector<8x128xf32>
    %14 = arith.mulf %3, %3 : vector<8x128xf32>
    %15 = arith.addf %13, %14 : vector<8x128xf32>
    %16 = math.sqrt %15 : vector<8x128xf32>
    %cst = arith.constant 9.99999974E-5 : f32
    %17 = vector.broadcast %cst : f32 to vector<8x128xf32>
    %18 = arith.addf %12, %17 : vector<8x128xf32>
    %19 = math.log %18 : vector<8x128xf32>
    %cst_12 = arith.constant 9.99999974E-5 : f32
    %20 = vector.broadcast %cst_12 : f32 to vector<8x128xf32>
    %21 = arith.addf %16, %20 : vector<8x128xf32>
    %22 = math.log %21 : vector<8x128xf32>
    %23 = arith.subf %19, %22 : vector<8x128xf32>
    %24 = math.absf %19 : vector<8x128xf32>
    %cst_13 = arith.constant 0.00999999977 : f32
    %25 = vector.broadcast %cst_13 : f32 to vector<8x128xf32>
    %26 = arith.addf %24, %25 : vector<8x128xf32>
    %27 = tpu.reciprocal %26 {approx = true} : vector<8x128xf32> -> vector<8x128xf32>
    %28 = arith.mulf %26, %27 : vector<8x128xf32>
    %cst_14 = arith.constant 2.000000e+00 : f32
    %29 = vector.broadcast %cst_14 : f32 to vector<8x128xf32>
    %30 = arith.subf %29, %28 : vector<8x128xf32>
    %31 = arith.mulf %27, %30 : vector<8x128xf32>
    %32 = arith.mulf %26, %31 : vector<8x128xf32>
    %cst_15 = arith.constant 2.000000e+00 : f32
    %33 = vector.broadcast %cst_15 : f32 to vector<8x128xf32>
    %34 = arith.subf %33, %32 : vector<8x128xf32>
    %35 = arith.mulf %31, %34 : vector<8x128xf32>
    %36 = arith.mulf %35, %35 : vector<8x128xf32>
    %37 = arith.mulf %23, %23 : vector<8x128xf32>
    %38 = arith.mulf %37, %36 : vector<8x128xf32>
    %39 = arith.mulf %38, %4 : vector<8x128xf32>
    %c0_16 = arith.constant 0 : index
    %c0_17 = arith.constant 0 : index
    %40 = vector.load %arg8[%c0_16, %c0_17] : memref<8x128xf32, #tpu.memory_space<vmem>>, vector<8x128xf32>
    %41 = arith.addf %40, %39 : vector<8x128xf32>
    %c0_18 = arith.constant 0 : index
    %c0_19 = arith.constant 0 : index
    %42 = vector.load %arg8[%c0_18, %c0_19] : memref<8x128xf32, #tpu.memory_space<vmem>>, vector<8x128xf32>
    tpu.vector_store %arg8[%c0_18, %c0_19], %41 {strides = array<i32>} : memref<8x128xf32, #tpu.memory_space<vmem>>, vector<8x128xf32>,
    %cst_20 = arith.constant -5.000000e-01 : f32
    %43 = vector.broadcast %cst_20 : f32 to vector<8x128xf32>
    %44 = arith.mulf %5, %43 : vector<8x128xf32>
    %45 = math.exp %44 : vector<8x128xf32>
    %cst_21 = arith.constant 1.000000e+00 : f32
    %46 = vector.broadcast %cst_21 : f32 to vector<8x128xf32>
    %47 = arith.subf %46, %45 : vector<8x128xf32>
    %48 = arith.mulf %19, %47 : vector<8x128xf32>
    %c0_22 = arith.constant 0 : index
    %c0_23 = arith.constant 0 : index
    %49 = vector.load %arg9[%c0_22, %c0_23] : memref<8x128xf32, #tpu.memory_space<vmem>>, vector<8x128xf32>
    %50 = arith.mulf %48, %48 : vector<8x128xf32>
    %cst_24 = arith.constant 5.000000e-01 : f32
    %51 = vector.broadcast %cst_24 : f32 to vector<8x128xf32>
    %52 = arith.mulf %51, %50 : vector<8x128xf32>
    %53 = arith.mulf %52, %36 : vector<8x128xf32>
    %54 = arith.addf %49, %53 : vector<8x128xf32>
    %c0_25 = arith.constant 0 : index
    %c0_26 = arith.constant 0 : index
    %55 = vector.load %arg9[%c0_25, %c0_26] : memref<8x128xf32, #tpu.memory_space<vmem>>, vector<8x128xf32>
    tpu.vector_store %arg9[%c0_25, %c0_26], %54 {strides = array<i32>} : memref<8x128xf32, #tpu.memory_space<vmem>>, vector<8x128xf32>,
    return
  }
  func.func @transform_0(%arg0: i32, %arg1: i32) -> (i32, i32) {
    %c1_i32 = arith.constant 1 : i32
    %0 = arith.muli %arg0, %c1_i32 : i32
    %1 = arith.addi %0, %arg1 : i32
    %c0_i32 = arith.constant 0 : i32
    %c0_i32_0 = arith.constant 0 : i32
    return %1, %c0_i32 : i32, i32
  }
  func.func @transform_1(%arg0: i32, %arg1: i32) -> (i32, i32) {
    %c1_i32 = arith.constant 1 : i32
    %0 = arith.muli %arg0, %c1_i32 : i32
    %1 = arith.addi %0, %arg1 : i32
    %c0_i32 = arith.constant 0 : i32
    %c0_i32_0 = arith.constant 0 : i32
    return %1, %c0_i32 : i32, i32
  }
  func.func @transform_2(%arg0: i32, %arg1: i32) -> (i32, i32) {
    %c1_i32 = arith.constant 1 : i32
    %0 = arith.muli %arg0, %c1_i32 : i32
    %1 = arith.addi %0, %arg1 : i32
    %c0_i32 = arith.constant 0 : i32
    %c0_i32_0 = arith.constant 0 : i32
    return %1, %c0_i32 : i32, i32
  }
  func.func @transform_3(%arg0: i32, %arg1: i32) -> (i32, i32) {
    %c1_i32 = arith.constant 1 : i32
    %0 = arith.muli %arg0, %c1_i32 : i32
    %1 = arith.addi %0, %arg1 : i32
    %c0_i32 = arith.constant 0 : i32
    %c0_i32_0 = arith.constant 0 : i32
    return %1, %c0_i32 : i32, i32
  }
  func.func @transform_4(%arg0: i32, %arg1: i32) -> (i32, i32) {
    %c1_i32 = arith.constant 1 : i32
    %0 = arith.muli %arg0, %c1_i32 : i32
    %1 = arith.addi %0, %arg1 : i32
    %c0_i32 = arith.constant 0 : i32
    %c0_i32_0 = arith.constant 0 : i32
    return %1, %c0_i32 : i32, i32
  }
  func.func @transform_5(%arg0: i32, %arg1: i32) -> (i32, i32) {
    %c1_i32 = arith.constant 1 : i32
    %0 = arith.muli %arg0, %c1_i32 : i32
    %1 = arith.addi %0, %arg1 : i32
    %c0_i32 = arith.constant 0 : i32
    %c0_i32_0 = arith.constant 0 : i32
    return %1, %c0_i32 : i32, i32
  }
  func.func @transform_6(%arg0: i32, %arg1: i32) -> (i32, i32) {
    %c0_i32 = arith.constant 0 : i32
    %c0_i32_0 = arith.constant 0 : i32
    return %arg0, %c0_i32 : i32, i32
  }
  func.func @transform_7(%arg0: i32, %arg1: i32) -> (i32, i32) {
    %c0_i32 = arith.constant 0 : i32
    %c0_i32_0 = arith.constant 0 : i32
    return %arg0, %c0_i32 : i32, i32
  }
}

</mosaic_0001>

<bundles_post_ra>
// kernel: _forward.1
= control target key start
LH: loop header
LB: loop body
LE: loop exit
PB: predicated region body
PF: predicated region fallthrough
CT: control target
= control target key end

     0   :  { %s314_s0 = inlined_call_operand.vmem [shape: f32[8,128], index: 0, kind: input, shape index: {}]   ;;  %s315_s1 = inlined_call_operand.vmem [shape: f32[8,128], index: 1, kind: input, shape index: {}]   ;;  %s316_s2 = inlined_call_operand.vmem [shape: f32[8,128], index: 2, kind: input, shape index: {}]   ;;  %s317_s3 = inlined_call_operand.vmem [shape: f32[8,128], index: 3, kind: input, shape index: {}]   ;;  %s318_s5 = inlined_call_operand.vmem [shape: f32[8,128], index: 5, kind: input, shape index: {}]   ;;  %s319_s4 = inlined_call_operand.vmem [shape: f32[8,128], index: 4, kind: input, shape index: {}]   ;;  %s320_s7 = inlined_call_operand.vmem [shape: f32[8,128], index: 7, kind: output, shape index: {1}]   ;;  %s321_s6 = inlined_call_operand.vmem [shape: f32[8,128], index: 6, kind: output, shape index: {0}]  }
   0x1   :  { %v127_v0 = vld [vmem:[%s314_s0] sm:$0xff] }
   0x2   :  { %v128_v1 = vld [vmem:[%s315_s1] sm:$0xff]  ;;  %v139_v4 = vmul.f32 %v127_v0, %v127_v0 }
   0x3   :  { %v129_v2 = vld [vmem:[%s316_s2] sm:$0xff]  ;;  %v140_v5 = vmul.f32 %v128_v1, %v128_v1 }
   0x4   :  { %v130_v3 = vld [vmem:[%s317_s3] sm:$0xff]  ;;  %v149_v7 = vmul.f32 %v129_v2, %v129_v2 }
   0x5   :  { %v141_v6 = vadd.f32 %v140_v5, %v139_v4  ;;  %v150_v8 = vmul.f32 %v130_v3, %v130_v3  ;;  %v132_v18 = vld [vmem:[%s318_s5] sm:$0xff] }
   0x6   :  { %v182_v20 = vmul.f32 -0.5, %v132_v18  ;;  %v131_v46 = vld [vmem:[%s319_s4] sm:$0xff] }
   0x7   :  { %238 = vrsqrt.f32 %v141_v6  ;;  %v151_v9 = vadd.f32 %v150_v8, %v149_v7  ;;  %vm144_vm0 = vcmp.eq.f32.partialorder %v141_v6, inf  ;;  %v147_v11 = vand.u32 2147483648, %v141_v6 }
   0x8   :  { %vm146_vm1 = vcmp.eq.f32.partialorder %v141_v6, 0.0  ;;  %v183_v23 = vmul.f32 1.442695, %v182_v20 }
   0x9   :  { %240 = vrsqrt.f32 %v151_v9  ;;  %vm154_vm2 = vcmp.eq.f32.partialorder %v151_v9, inf  ;;  %v157_v19 = vand.u32 2147483648, %v151_v9  ;;  %vm156_vm3 = vcmp.eq.f32.partialorder %v151_v9, 0.0 }
  0x11   :  { %v239_v10 = vpop.eup %238 }
  0x12   :  { %v143_v12 = vmul.f32 %v239_v10, %v141_v6 }
  0x13   :  { %v241_v16 = vpop.eup %240 }
  0x14   :  { %v145_v13 = vsel %vm144_vm0, %v141_v6, %v143_v12  ;;  %v153_v17 = vmul.f32 %v241_v16, %v151_v9 }
  0x15   :  { %v148_v14 = vsel %vm146_vm1, %v147_v11, %v145_v13 }
  0x16   :  { %v159_v15 = vadd.f32 0.0001, %v148_v14  ;;  %v155_v21 = vsel %vm154_vm2, %v151_v9, %v153_v17 }
  0x17   :  { %v158_v22 = vsel %vm156_vm3, %v157_v19, %v155_v21 }
  0x18   :  { %242 = vlog2.f32 %v159_v15  ;;  %v162_v26 = vadd.f32 0.0001, %v158_v22 }
  0x19   :  { %244 = vpow2.f32 %v183_v23 }
  0x1a   :  { %246 = vlog2.f32 %v162_v26 }
  0x22   :  { %v243_v24 = vpop.eup %242 }
  0x23   :  { %v161_v25 = vmul.f32 0.6931472, %v243_v24  ;;  %v245_v29 = vpop.eup %244 }
  0x24   :  { %v247_v30 = vpop.eup %246  ;;  %v185_v31 = vsub.f32 1.0, %v245_v29 }
  0x25   :  { %v166_v27 = vand.u32 2147483647, %v161_v25  ;;  %v164_v34 = vmul.f32 0.6931472, %v247_v30 }
  0x26   :  { %v186_v36 = vmul.f32 %v185_v31, %v161_v25 }
  0x27   :  { %v167_v28 = vadd.f32 0.01, %v166_v27  ;;  %v165_v38 = vsub.f32 %v161_v25, %v164_v34 }
  0x28   :  { %v188_v40 = vmul.f32 %v186_v36, %v186_v36 }
  0x29   :  { %248 = vrcp.f32 %v167_v28  ;;  %v176_v43 = vmul.f32 %v165_v38, %v165_v38 }
  0x2a   :  { %v189_v44 = vmul.f32 0.5, %v188_v40 }
  0x33   :  { %v249_v32 = vpop.eup %248 }
  0x34   :  { %v169_v33 = vmul.f32 %v249_v32, %v167_v28 }
  0x36   :  { %v170_v35 = vsub.f32 2.0, %v169_v33 }
  0x38   :  { %v171_v37 = vmul.f32 %v249_v32, %v170_v35 }
  0x3a   :  { %v172_v39 = vmul.f32 %v171_v37, %v167_v28 }
  0x3c   :  { %v173_v41 = vsub.f32 2.0, %v172_v39 }
  0x3e   :  { %v174_v42 = vmul.f32 %v173_v41, %v171_v37 }
  0x40   :  { %v175_v45 = vmul.f32 %v174_v42, %v174_v42 }
  0x42   :  { %v177_v47 = vmul.f32 %v176_v43, %v175_v45  ;;  %v190_v48 = vmul.f32 %v189_v44, %v175_v45 }
  0x44   :  { %v178_v49 = vmul.f32 %v177_v47, %v131_v46  ;;  %192 = vst [vmem:[%s320_s7] sm:$0xff] %v190_v48 }
  0x46   :  { %181 = vst [vmem:[%s321_s6] sm:$0xff] %v178_v49 }

</bundles_post_ra>
